<compile_context>
chip_gen: v6e
topology: v6e:2x2x1
jax: 0.10.0
libtpu: 0.0.40
codegen_flags: <defaults>
</compile_context>

<pallas_src>
import jax
import jax.numpy as jnp
import numpy as np
from jax.experimental import pallas as pl
from jax.experimental.pallas import tpu as pltpu

# Deterministic "parameters" of the two sub-models (Gaussian kernel bandwidths).
SLOPES = (1.0, 2.0)
# min_m exp(-d / (2 s_m^2)) for a shared d >= 0 is exp(-d * max_m 1/(2 s_m^2)).
_MAX_INV = max(1.0 / (2.0 * s * s) for s in SLOPES)


def _batch_multi_kernel(nb_facts_ref, nb_entities_ref,            # SMEM scalar prefetch
                        rel_ref, a1_ref, a2_ref,                   # (Bt, 1, E)
                        fr_ref, fa1_ref, fa2_ref,                  # (Bt, F, E)
                        ent_ref,                                   # (Bt, E, N)
                        sp_ref, po_ref):                           # (1, 1, Bt*N)
    g = pl.program_id(0)
    Bt, F, _ = fr_ref.shape
    N = ent_ref.shape[2]
    f32 = jnp.float32

    f_ids = jax.lax.broadcasted_iota(jnp.int32, (F, 1), 0)   # hoisted out of bi loop
    n_ids = jax.lax.broadcasted_iota(jnp.int32, (1, N), 1)
    inf = jnp.float32(jnp.inf)
    dims = (((1,), (0,)), ((), ()))        # contract the embedding axis: (F,E) x (E,N)

    rows_sp = []
    rows_po = []
    for bi in range(Bt):                   # static unroll; Bt is capped at 8 sublanes
        b = g * Bt + bi

        r = rel_ref[bi].astype(f32)        # (1, E)
        a1 = a1_ref[bi].astype(f32)
        a2 = a2_ref[bi].astype(f32)
        fr = fr_ref[bi]                    # (F, E) in native (possibly bf16) dtype
        fa1 = fa1_ref[bi]
        fa2 = fa2_ref[bi]
        ent = ent_ref[bi]                  # (E, N)

        # Query–fact squared distances: exact differences (no cancellation).
        dr = fr.astype(f32) - r
        da1 = fa1.astype(f32) - a1
        da2 = fa2.astype(f32) - a2
        d_rel = jnp.sum(dr * dr, axis=-1, keepdims=True)       # (F, 1)
        d_a1 = jnp.sum(da1 * da1, axis=-1, keepdims=True)      # (F, 1)
        d_a2 = jnp.sum(da2 * da2, axis=-1, keepdims=True)      # (F, 1)

        # Entity–fact squared distances via ||f||^2 + ||e||^2 - 2 f.e  (MXU dots,
        # sublane-reduced entity norms; no one-row MXU push).
        dots1 = jax.lax.dot_general(fa1, ent, dims, preferred_element_type=f32)  # (F, N)
        dots2 = jax.lax.dot_general(fa2, ent, dims, preferred_element_type=f32)  # (F, N)
        entf = ent.astype(f32)
        ent_sq = jnp.sum(entf * entf, axis=0, keepdims=True)                     # (1, N)
        fa1f = fa1.astype(f32)
        fa2f = fa2.astype(f32)
        fa1_sq = jnp.sum(fa1f * fa1f, axis=-1, keepdims=True)                    # (F, 1)
        fa2_sq = jnp.sum(fa2f * fa2f, axis=-1, keepdims=True)                    # (F, 1)

        d_e1 = fa1_sq + ent_sq - 2.0 * dots1     # ||e_n - farg1_f||^2   (F, N)
        d_e2 = fa2_sq + ent_sq - 2.0 * dots2     # ||e_n - farg2_f||^2   (F, N)

        # Clamp: the decomposed entity term can go slightly negative from cancellation.
        dist_sp = jnp.maximum(d_rel + d_a1 + d_e2, 0.0)   # (F, N)
        dist_po = jnp.maximum(d_rel + d_a2 + d_e1, 0.0)   # (F, N)

        nf = nb_facts_ref[b]
        ne = nb_entities_ref[b]
        fvalid = f_ids < nf                   # select, not a float-mask multiply
        dmin_sp = jnp.min(jnp.where(fvalid, dist_sp, inf), axis=0, keepdims=True)  # (1, N)
        dmin_po = jnp.min(jnp.where(fvalid, dist_po, inf), axis=0, keepdims=True)  # (1, N)

        # exp is monotone: max-over-facts and min-over-(Gaussian)-models both commute
        # with it, so a single exp with the largest inverse bandwidth suffices.
        # nb_facts == 0 -> dmin = +inf -> exp(-inf) = 0, matching mask-then-max.
        res_sp = jnp.exp(-dmin_sp * _MAX_INV)
        res_po = jnp.exp(-dmin_po * _MAX_INV)

        evalid = n_ids < ne
        rows_sp.append(jnp.where(evalid, res_sp, 0.0))
        rows_po.append(jnp.where(evalid, res_po, 0.0))

    # One lane-dense full-block store per output per grid step.
    sp_ref[...] = jnp.concatenate(rows_sp, axis=1).reshape(1, 1, Bt * N)
    po_ref[...] = jnp.concatenate(rows_po, axis=1).reshape(1, 1, Bt * N)


def _choose_bt(B, F, E, N, itemsize, vmem_budget_bytes):
    """Largest batch-block (<= 8, static unroll) whose double-buffered blocks fit VMEM,
    clamped so the grid has >= 2 steps (megacore sharding on v7x)."""
    per_b_in = (3 * E + 3 * F * E + E * N) * itemsize      # query + fact + entity blocks
    per_b_out = 2 * N * 4                                  # two f32 output rows
    bt = 1
    for cand in (8, 4, 2):
        if 2 * cand * (per_b_in + per_b_out) <= vmem_budget_bytes:   # double-buffered
            bt = cand
            break
    bt = min(bt, B)
    if B >= 2:
        bt = min(bt, -(-B // 2))    # guarantee >= 2 grid steps
    return max(bt, 1)


def batch_multi_forward(rel, arg1, arg2, facts, nb_facts, entity_embeddings,
                        nb_entities, cast_inputs_to_bf16=False):
    """Pallas implementation of BatchMulti.forward -> (score_sp, score_po), each (B, N)."""
    frel, farg1, farg2 = facts
    B, E = rel.shape
    F = frel.shape[1]
    N = entity_embeddings.shape[1]

    in_dtype = jnp.bfloat16 if cast_inputs_to_bf16 else jnp.float32
    itemsize = 2 if cast_inputs_to_bf16 else 4

    # Conservative budget: fits v5e's 16 MiB default scoped VMEM and v7x's 64 MiB part.
    Bt = _choose_bt(B, F, E, N, itemsize, vmem_budget_bytes=12 * 1024 * 1024)
    G = -(-B // Bt)
    B_pad = G * Bt

    def pad_b(x):
        if B_pad == B:
            return x
        cfg = [(0, B_pad - B)] + [(0, 0)] * (x.ndim - 1)
        return jnp.pad(x, cfg)

    # Queries stay f32 (tiny); facts / entities optionally bf16 (MXU-native, f32 acc).
    rel3 = pad_b(rel.astype(jnp.float32))[:, None, :]                       # (B_pad, 1, E)
    a13 = pad_b(arg1.astype(jnp.float32))[:, None, :]
    a23 = pad_b(arg2.astype(jnp.float32))[:, None, :]
    fr = pad_b(frel.astype(in_dtype))                                       # (B_pad, F, E)
    fa1 = pad_b(farg1.astype(in_dtype))
    fa2 = pad_b(farg2.astype(in_dtype))
    entT = pad_b(jnp.swapaxes(entity_embeddings, 1, 2).astype(in_dtype))    # (B_pad, E, N)
    nf = pad_b(nb_facts.astype(jnp.int32))                                  # padded rows: 0
    ne = pad_b(nb_entities.astype(jnp.int32))

    grid_spec = pltpu.PrefetchScalarGridSpec(
        num_scalar_prefetch=2,            # nb_facts, nb_entities -> SMEM
        grid=(G,),
        in_specs=[
            pl.BlockSpec((Bt, 1, E), lambda g, nf, ne: (g, 0, 0)),   # rel
            pl.BlockSpec((Bt, 1, E), lambda g, nf, ne: (g, 0, 0)),   # arg1
            pl.BlockSpec((Bt, 1, E), lambda g, nf, ne: (g, 0, 0)),   # arg2
            pl.BlockSpec((Bt, F, E), lambda g, nf, ne: (g, 0, 0)),   # frel
            pl.BlockSpec((Bt, F, E), lambda g, nf, ne: (g, 0, 0)),   # farg1
            pl.BlockSpec((Bt, F, E), lambda g, nf, ne: (g, 0, 0)),   # farg2
            pl.BlockSpec((Bt, E, N), lambda g, nf, ne: (g, 0, 0)),   # entities^T
        ],
        out_specs=[
            pl.BlockSpec((1, 1, Bt * N), lambda g, nf, ne: (g, 0, 0)),  # score_sp slab
            pl.BlockSpec((1, 1, Bt * N), lambda g, nf, ne: (g, 0, 0)),  # score_po slab
        ],
    )

    sp, po = pl.pallas_call(
        _batch_multi_kernel,
        out_shape=(jax.ShapeDtypeStruct((G, 1, Bt * N), jnp.float32),
                   jax.ShapeDtypeStruct((G, 1, Bt * N), jnp.float32)),
        grid_spec=grid_spec,
        compiler_params=pltpu.CompilerParams(
            dimension_semantics=("parallel",),
            vmem_limit_bytes=32 * 1024 * 1024),
    )(nf, ne, rel3, a13, a23, fr, fa1, fa2, entT)

    # Lane-dense (G, 1, Bt*N) slabs -> (B, N): free layout plumbing in the wrapper.
    sp = sp.reshape(B_pad, N)[:B]
    po = po.reshape(B_pad, N)[:B]
    return sp, po


def _reference(rel, arg1, arg2, facts, nb_facts, entity_embeddings, nb_entities):
    """Pure-JAX reference (full per-model loop, mask-then-max, direct differences)."""
    frel, farg1, farg2 = facts
    B, N, E = entity_embeddings.shape
    F = frel.shape[1]
    ent = entity_embeddings
    fcat = jnp.concatenate([frel, farg1, farg2], axis=-1)                       # (B, F, 3E)
    rel_b = jnp.broadcast_to(rel[:, None, :], (B, N, E))
    a1_b = jnp.broadcast_to(arg1[:, None, :], (B, N, E))
    a2_b = jnp.broadcast_to(arg2[:, None, :], (B, N, E))
    q_sp = jnp.concatenate([rel_b, a1_b, ent], axis=-1)                         # (B, N, 3E)
    q_po = jnp.concatenate([rel_b, ent, a2_b], axis=-1)                         # (B, N, 3E)
    fmask = (jnp.arange(F)[None, None, :] < nb_facts[:, None, None]).astype(jnp.float32)
    emask = (jnp.arange(N)[None, :] < nb_entities[:, None]).astype(jnp.float32)

    def one_model(slope):
        def score(q):
            d = jnp.sum((q[:, :, None, :] - fcat[:, None, :, :]) ** 2, axis=-1)  # (B, N, F)
            sim = jnp.exp(-d / (2.0 * slope * slope))
            return jnp.max(sim * fmask, axis=-1) * emask
        return score(q_sp), score(q_po)

    res_sp = res_po = None
    for s in SLOPES:
        sp, po = one_model(s)
        res_sp = sp if res_sp is None else jnp.minimum(res_sp, sp)
        res_po = po if res_po is None else jnp.minimum(res_po, po)
    return res_sp, res_po


if __name__ == "__main__":
    B, E, F, N = 3, 32, 8, 16
    key = jax.random.PRNGKey(0)
    ks = jax.random.split(key, 7)
    scale = 0.15  # keep squared distances O(1) so Gaussian sims are non-trivial
    rel = scale * jax.random.normal(ks[0], (B, E), jnp.float32)
    arg1 = scale * jax.random.normal(ks[1], (B, E), jnp.float32)
    arg2 = scale * jax.random.normal(ks[2], (B, E), jnp.float32)
    frel = scale * jax.random.normal(ks[3], (B, F, E), jnp.float32)
    farg1 = scale * jax.random.normal(ks[4], (B, F, E), jnp.float32)
    farg2 = scale * jax.random.normal(ks[5], (B, F, E), jnp.float32)
    entity_embeddings = scale * jax.random.normal(ks[6], (B, N, E), jnp.float32)
    nb_facts = jnp.array([F, 5, 3], dtype=jnp.int32)
    nb_entities = jnp.array([N, 10, 7], dtype=jnp.int32)
    facts = [frel, farg1, farg2]

    sp, po = batch_multi_forward(rel, arg1, arg2, facts, nb_facts,
                                 entity_embeddings, nb_entities)
    jax.block_until_ready((sp, po))

    ref_sp, ref_po = _reference(rel, arg1, arg2, facts, nb_facts,
                                entity_embeddings, nb_entities)
    np.testing.assert_allclose(np.asarray(sp), np.asarray(ref_sp), rtol=1e-4, atol=1e-5)
    np.testing.assert_allclose(np.asarray(po), np.asarray(ref_po), rtol=1e-4, atol=1e-5)

    print("KERNEL_OK")
</pallas_src>

<mosaic_0001>
module attributes {stable_mosaic.version = 11 : i64} {
  func.func @_batch_multi_kernel(%arg0: i32, %arg1: memref<4xi32, #tpu.memory_space<smem>>, %arg2: memref<4xi32, #tpu.memory_space<smem>>, %arg3: memref<2x1x32xf32, #tpu.memory_space<vmem>>, %arg4: memref<2x1x32xf32, #tpu.memory_space<vmem>>, %arg5: memref<2x1x32xf32, #tpu.memory_space<vmem>>, %arg6: memref<2x8x32xf32, #tpu.memory_space<vmem>>, %arg7: memref<2x8x32xf32, #tpu.memory_space<vmem>>, %arg8: memref<2x8x32xf32, #tpu.memory_space<vmem>>, %arg9: memref<2x32x16xf32, #tpu.memory_space<vmem>>, %arg10: memref<1x1x32xf32, #tpu.memory_space<vmem>>, %arg11: memref<1x1x32xf32, #tpu.memory_space<vmem>>) attributes {dimension_semantics = [#tpu.dimension_semantics<parallel>], iteration_bounds = array<i64: 2>, scalar_prefetch = 2 : i64, scratch_operands = 0 : i64, tpu.core_type = #tpu.core_type<tc>, window_params = [{transform_indices = @transform_0, window_bounds = array<i64: 2, 1, 32>}, {transform_indices = @transform_1, window_bounds = array<i64: 2, 1, 32>}, {transform_indices = @transform_2, window_bounds = array<i64: 2, 1, 32>}, {transform_indices = @transform_3, window_bounds = array<i64: 2, 8, 32>}, {transform_indices = @transform_4, window_bounds = array<i64: 2, 8, 32>}, {transform_indices = @transform_5, window_bounds = array<i64: 2, 8, 32>}, {transform_indices = @transform_6, window_bounds = array<i64: 2, 32, 16>}, {transform_indices = @transform_7, window_bounds = array<i64: 1, 1, 32>}, {transform_indices = @transform_8, window_bounds = array<i64: 1, 1, 32>}]} {
    %0 = tpu.iota {dimensions = array<i32: 0>} : vector<8x1xi32>
    %1 = tpu.iota {dimensions = array<i32: 1>} : vector<1x16xi32>
    %c2_i32 = arith.constant 2 : i32
    %2 = arith.muli %arg0, %c2_i32 : i32
    %c0_i32 = arith.constant 0 : i32
    %3 = arith.addi %2, %c0_i32 : i32
    %c0 = arith.constant 0 : index
    %c0_0 = arith.constant 0 : index
    %c0_1 = arith.constant 0 : index
    %4 = vector.load %arg3[%c0, %c0_0, %c0_1] : memref<2x1x32xf32, #tpu.memory_space<vmem>>, vector<1x1x32xf32>
    %5 = vector.shape_cast %4 : vector<1x1x32xf32> to vector<1x32xf32>
    %c0_2 = arith.constant 0 : index
    %c0_3 = arith.constant 0 : index
    %c0_4 = arith.constant 0 : index
    %6 = vector.load %arg4[%c0_2, %c0_3, %c0_4] : memref<2x1x32xf32, #tpu.memory_space<vmem>>, vector<1x1x32xf32>
    %7 = vector.shape_cast %6 : vector<1x1x32xf32> to vector<1x32xf32>
    %c0_5 = arith.constant 0 : index
    %c0_6 = arith.constant 0 : index
    %c0_7 = arith.constant 0 : index
    %8 = vector.load %arg5[%c0_5, %c0_6, %c0_7] : memref<2x1x32xf32, #tpu.memory_space<vmem>>, vector<1x1x32xf32>
    %9 = vector.shape_cast %8 : vector<1x1x32xf32> to vector<1x32xf32>
    %c0_8 = arith.constant 0 : index
    %c0_9 = arith.constant 0 : index
    %c0_10 = arith.constant 0 : index
    %10 = vector.load %arg6[%c0_8, %c0_9, %c0_10] : memref<2x8x32xf32, #tpu.memory_space<vmem>>, vector<1x8x32xf32>
    %11 = vector.shape_cast %10 : vector<1x8x32xf32> to vector<8x32xf32>
    %c0_11 = arith.constant 0 : index
    %c0_12 = arith.constant 0 : index
    %c0_13 = arith.constant 0 : index
    %12 = vector.load %arg7[%c0_11, %c0_12, %c0_13] : memref<2x8x32xf32, #tpu.memory_space<vmem>>, vector<1x8x32xf32>
    %13 = vector.shape_cast %12 : vector<1x8x32xf32> to vector<8x32xf32>
    %c0_14 = arith.constant 0 : index
    %c0_15 = arith.constant 0 : index
    %c0_16 = arith.constant 0 : index
    %14 = vector.load %arg8[%c0_14, %c0_15, %c0_16] : memref<2x8x32xf32, #tpu.memory_space<vmem>>, vector<1x8x32xf32>
    %15 = vector.shape_cast %14 : vector<1x8x32xf32> to vector<8x32xf32>
    %c0_17 = arith.constant 0 : index
    %c0_18 = arith.constant 0 : index
    %c0_19 = arith.constant 0 : index
    %16 = vector.load %arg9[%c0_17, %c0_18, %c0_19] : memref<2x32x16xf32, #tpu.memory_space<vmem>>, vector<1x32x16xf32>
    %17 = vector.shape_cast %16 : vector<1x32x16xf32> to vector<32x16xf32>
    %18 = vector.broadcast %5 : vector<1x32xf32> to vector<8x32xf32>
    %19 = arith.subf %11, %18 : vector<8x32xf32>
    %20 = vector.broadcast %7 : vector<1x32xf32> to vector<8x32xf32>
    %21 = arith.subf %13, %20 : vector<8x32xf32>
    %22 = vector.broadcast %9 : vector<1x32xf32> to vector<8x32xf32>
    %23 = arith.subf %15, %22 : vector<8x32xf32>
    %24 = arith.mulf %19, %19 : vector<8x32xf32>
    %cst = arith.constant dense<0.000000e+00> : vector<8xf32>
    %25 = vector.multi_reduction <add>, %24, %cst [1] : vector<8x32xf32> to vector<8xf32>
    %26 = vector.shape_cast %25 : vector<8xf32> to vector<8x1xf32>
    %27 = arith.mulf %21, %21 : vector<8x32xf32>
    %cst_20 = arith.constant dense<0.000000e+00> : vector<8xf32>
    %28 = vector.multi_reduction <add>, %27, %cst_20 [1] : vector<8x32xf32> to vector<8xf32>
    %29 = vector.shape_cast %28 : vector<8xf32> to vector<8x1xf32>
    %30 = arith.mulf %23, %23 : vector<8x32xf32>
    %cst_21 = arith.constant dense<0.000000e+00> : vector<8xf32>
    %31 = vector.multi_reduction <add>, %30, %cst_21 [1] : vector<8x32xf32> to vector<8xf32>
    %32 = vector.shape_cast %31 : vector<8xf32> to vector<8x1xf32>
    %cst_22 = arith.constant dense<0.000000e+00> : vector<8x16xf32>
    %33 = tpu.matmul %13, %17, %cst_22 {dimension_numbers = #tpu.dot_dimension_numbers<[1], [0], [0], [1], [0, 0, 1, 1], [], []>} : vector<8x32xf32>, vector<32x16xf32>, vector<8x16xf32> -> vector<8x16xf32>
    %cst_23 = arith.constant dense<0.000000e+00> : vector<8x16xf32>
    %34 = tpu.matmul %15, %17, %cst_23 {dimension_numbers = #tpu.dot_dimension_numbers<[1], [0], [0], [1], [0, 0, 1, 1], [], []>} : vector<8x32xf32>, vector<32x16xf32>, vector<8x16xf32> -> vector<8x16xf32>
    %35 = arith.mulf %17, %17 : vector<32x16xf32>
    %cst_24 = arith.constant dense<0.000000e+00> : vector<16xf32>
    %36 = vector.multi_reduction <add>, %35, %cst_24 [0] : vector<32x16xf32> to vector<16xf32>
    %37 = vector.shape_cast %36 : vector<16xf32> to vector<1x16xf32>
    %38 = arith.mulf %13, %13 : vector<8x32xf32>
    %cst_25 = arith.constant dense<0.000000e+00> : vector<8xf32>
    %39 = vector.multi_reduction <add>, %38, %cst_25 [1] : vector<8x32xf32> to vector<8xf32>
    %40 = vector.shape_cast %39 : vector<8xf32> to vector<8x1xf32>
    %41 = arith.mulf %15, %15 : vector<8x32xf32>
    %cst_26 = arith.constant dense<0.000000e+00> : vector<8xf32>
    %42 = vector.multi_reduction <add>, %41, %cst_26 [1] : vector<8x32xf32> to vector<8xf32>
    %43 = vector.shape_cast %42 : vector<8xf32> to vector<8x1xf32>
    %44 = vector.broadcast %40 : vector<8x1xf32> to vector<8x16xf32>
    %45 = vector.broadcast %37 : vector<1x16xf32> to vector<8x16xf32>
    %46 = arith.addf %44, %45 : vector<8x16xf32>
    %cst_27 = arith.constant 2.000000e+00 : f32
    %47 = vector.broadcast %cst_27 : f32 to vector<8x16xf32>
    %48 = arith.mulf %47, %33 : vector<8x16xf32>
    %49 = arith.subf %46, %48 : vector<8x16xf32>
    %50 = vector.broadcast %43 : vector<8x1xf32> to vector<8x16xf32>
    %51 = vector.broadcast %37 : vector<1x16xf32> to vector<8x16xf32>
    %52 = arith.addf %50, %51 : vector<8x16xf32>
    %cst_28 = arith.constant 2.000000e+00 : f32
    %53 = vector.broadcast %cst_28 : f32 to vector<8x16xf32>
    %54 = arith.mulf %53, %34 : vector<8x16xf32>
    %55 = arith.subf %52, %54 : vector<8x16xf32>
    %56 = arith.addf %26, %29 : vector<8x1xf32>
    %57 = vector.broadcast %56 : vector<8x1xf32> to vector<8x16xf32>
    %58 = arith.addf %57, %55 : vector<8x16xf32>
    %cst_29 = arith.constant 0.000000e+00 : f32
    %59 = vector.broadcast %cst_29 : f32 to vector<8x16xf32>
    %60 = arith.maximumf %58, %59 : vector<8x16xf32>
    %61 = arith.addf %26, %32 : vector<8x1xf32>
    %62 = vector.broadcast %61 : vector<8x1xf32> to vector<8x16xf32>
    %63 = arith.addf %62, %49 : vector<8x16xf32>
    %cst_30 = arith.constant 0.000000e+00 : f32
    %64 = vector.broadcast %cst_30 : f32 to vector<8x16xf32>
    %65 = arith.maximumf %63, %64 : vector<8x16xf32>
    %66 = arith.index_cast %3 : i32 to index
    %67 = memref.load %arg1[%66] : memref<4xi32, #tpu.memory_space<smem>>
    %68 = arith.index_cast %3 : i32 to index
    %69 = memref.load %arg2[%68] : memref<4xi32, #tpu.memory_space<smem>>
    %70 = vector.broadcast %67 : i32 to vector<8x1xi32>
    %71 = arith.cmpi slt, %0, %70 : vector<8x1xi32>
    %cst_31 = arith.constant 0x7F800000 : f32
    %72 = vector.shape_cast %71 : vector<8x1xi1> to vector<8x1xi1>
    %73 = vector.broadcast %72 : vector<8x1xi1> to vector<8x16xi1>
    %74 = vector.broadcast %cst_31 : f32 to vector<8x16xf32>
    %75 = arith.select %73, %60, %74 : vector<8x16xi1>, vector<8x16xf32>
    %cst_32 = arith.constant dense<0x7F800000> : vector<16xf32>
    %76 = vector.multi_reduction <minimumf>, %75, %cst_32 [0] : vector<8x16xf32> to vector<16xf32>
    %77 = vector.shape_cast %76 : vector<16xf32> to vector<1x16xf32>
    %cst_33 = arith.constant 0x7F800000 : f32
    %78 = vector.shape_cast %71 : vector<8x1xi1> to vector<8x1xi1>
    %79 = vector.broadcast %78 : vector<8x1xi1> to vector<8x16xi1>
    %80 = vector.broadcast %cst_33 : f32 to vector<8x16xf32>
    %81 = arith.select %79, %65, %80 : vector<8x16xi1>, vector<8x16xf32>
    %cst_34 = arith.constant dense<0x7F800000> : vector<16xf32>
    %82 = vector.multi_reduction <minimumf>, %81, %cst_34 [0] : vector<8x16xf32> to vector<16xf32>
    %83 = vector.shape_cast %82 : vector<16xf32> to vector<1x16xf32>
    %cst_35 = arith.constant 0.000000e+00 : f32
    %84 = vector.broadcast %cst_35 : f32 to vector<1x16xf32>
    %85 = arith.subf %84, %77 : vector<1x16xf32>
    %cst_36 = arith.constant 5.000000e-01 : f32
    %86 = vector.broadcast %cst_36 : f32 to vector<1x16xf32>
    %87 = arith.mulf %85, %86 : vector<1x16xf32>
    %88 = math.exp %87 : vector<1x16xf32>
    %cst_37 = arith.constant 0.000000e+00 : f32
    %89 = vector.broadcast %cst_37 : f32 to vector<1x16xf32>
    %90 = arith.subf %89, %83 : vector<1x16xf32>
    %cst_38 = arith.constant 5.000000e-01 : f32
    %91 = vector.broadcast %cst_38 : f32 to vector<1x16xf32>
    %92 = arith.mulf %90, %91 : vector<1x16xf32>
    %93 = math.exp %92 : vector<1x16xf32>
    %94 = vector.broadcast %69 : i32 to vector<1x16xi32>
    %95 = arith.cmpi slt, %1, %94 : vector<1x16xi32>
    %cst_39 = arith.constant 0.000000e+00 : f32
    %96 = vector.broadcast %cst_39 : f32 to vector<1x16xf32>
    %97 = arith.select %95, %88, %96 : vector<1x16xi1>, vector<1x16xf32>
    %cst_40 = arith.constant 0.000000e+00 : f32
    %98 = vector.broadcast %cst_40 : f32 to vector<1x16xf32>
    %99 = arith.select %95, %93, %98 : vector<1x16xi1>, vector<1x16xf32>
    %c2_i32_41 = arith.constant 2 : i32
    %100 = arith.muli %arg0, %c2_i32_41 : i32
    %c1_i32 = arith.constant 1 : i32
    %101 = arith.addi %100, %c1_i32 : i32
    %c1 = arith.constant 1 : index
    %c0_42 = arith.constant 0 : index
    %c0_43 = arith.constant 0 : index
    %102 = vector.load %arg3[%c1, %c0_42, %c0_43] : memref<2x1x32xf32, #tpu.memory_space<vmem>>, vector<1x1x32xf32>
    %103 = vector.shape_cast %102 : vector<1x1x32xf32> to vector<1x32xf32>
    %c1_44 = arith.constant 1 : index
    %c0_45 = arith.constant 0 : index
    %c0_46 = arith.constant 0 : index
    %104 = vector.load %arg4[%c1_44, %c0_45, %c0_46] : memref<2x1x32xf32, #tpu.memory_space<vmem>>, vector<1x1x32xf32>
    %105 = vector.shape_cast %104 : vector<1x1x32xf32> to vector<1x32xf32>
    %c1_47 = arith.constant 1 : index
    %c0_48 = arith.constant 0 : index
    %c0_49 = arith.constant 0 : index
    %106 = vector.load %arg5[%c1_47, %c0_48, %c0_49] : memref<2x1x32xf32, #tpu.memory_space<vmem>>, vector<1x1x32xf32>
    %107 = vector.shape_cast %106 : vector<1x1x32xf32> to vector<1x32xf32>
    %c1_50 = arith.constant 1 : index
    %c0_51 = arith.constant 0 : index
    %c0_52 = arith.constant 0 : index
    %108 = vector.load %arg6[%c1_50, %c0_51, %c0_52] : memref<2x8x32xf32, #tpu.memory_space<vmem>>, vector<1x8x32xf32>
    %109 = vector.shape_cast %108 : vector<1x8x32xf32> to vector<8x32xf32>
    %c1_53 = arith.constant 1 : index
    %c0_54 = arith.constant 0 : index
    %c0_55 = arith.constant 0 : index
    %110 = vector.load %arg7[%c1_53, %c0_54, %c0_55] : memref<2x8x32xf32, #tpu.memory_space<vmem>>, vector<1x8x32xf32>
    %111 = vector.shape_cast %110 : vector<1x8x32xf32> to vector<8x32xf32>
    %c1_56 = arith.constant 1 : index
    %c0_57 = arith.constant 0 : index
    %c0_58 = arith.constant 0 : index
    %112 = vector.load %arg8[%c1_56, %c0_57, %c0_58] : memref<2x8x32xf32, #tpu.memory_space<vmem>>, vector<1x8x32xf32>
    %113 = vector.shape_cast %112 : vector<1x8x32xf32> to vector<8x32xf32>
    %c1_59 = arith.constant 1 : index
    %c0_60 = arith.constant 0 : index
    %c0_61 = arith.constant 0 : index
    %114 = vector.load %arg9[%c1_59, %c0_60, %c0_61] : memref<2x32x16xf32, #tpu.memory_space<vmem>>, vector<1x32x16xf32>
    %115 = vector.shape_cast %114 : vector<1x32x16xf32> to vector<32x16xf32>
    %116 = vector.broadcast %103 : vector<1x32xf32> to vector<8x32xf32>
    %117 = arith.subf %109, %116 : vector<8x32xf32>
    %118 = vector.broadcast %105 : vector<1x32xf32> to vector<8x32xf32>
    %119 = arith.subf %111, %118 : vector<8x32xf32>
    %120 = vector.broadcast %107 : vector<1x32xf32> to vector<8x32xf32>
    %121 = arith.subf %113, %120 : vector<8x32xf32>
    %122 = arith.mulf %117, %117 : vector<8x32xf32>
    %cst_62 = arith.constant dense<0.000000e+00> : vector<8xf32>
    %123 = vector.multi_reduction <add>, %122, %cst_62 [1] : vector<8x32xf32> to vector<8xf32>
    %124 = vector.shape_cast %123 : vector<8xf32> to vector<8x1xf32>
    %125 = arith.mulf %119, %119 : vector<8x32xf32>
    %cst_63 = arith.constant dense<0.000000e+00> : vector<8xf32>
    %126 = vector.multi_reduction <add>, %125, %cst_63 [1] : vector<8x32xf32> to vector<8xf32>
    %127 = vector.shape_cast %126 : vector<8xf32> to vector<8x1xf32>
    %128 = arith.mulf %121, %121 : vector<8x32xf32>
    %cst_64 = arith.constant dense<0.000000e+00> : vector<8xf32>
    %129 = vector.multi_reduction <add>, %128, %cst_64 [1] : vector<8x32xf32> to vector<8xf32>
    %130 = vector.shape_cast %129 : vector<8xf32> to vector<8x1xf32>
    %cst_65 = arith.constant dense<0.000000e+00> : vector<8x16xf32>
    %131 = tpu.matmul %111, %115, %cst_65 {dimension_numbers = #tpu.dot_dimension_numbers<[1], [0], [0], [1], [0, 0, 1, 1], [], []>} : vector<8x32xf32>, vector<32x16xf32>, vector<8x16xf32> -> vector<8x16xf32>
    %cst_66 = arith.constant dense<0.000000e+00> : vector<8x16xf32>
    %132 = tpu.matmul %113, %115, %cst_66 {dimension_numbers = #tpu.dot_dimension_numbers<[1], [0], [0], [1], [0, 0, 1, 1], [], []>} : vector<8x32xf32>, vector<32x16xf32>, vector<8x16xf32> -> vector<8x16xf32>
    %133 = arith.mulf %115, %115 : vector<32x16xf32>
    %cst_67 = arith.constant dense<0.000000e+00> : vector<16xf32>
    %134 = vector.multi_reduction <add>, %133, %cst_67 [0] : vector<32x16xf32> to vector<16xf32>
    %135 = vector.shape_cast %134 : vector<16xf32> to vector<1x16xf32>
    %136 = arith.mulf %111, %111 : vector<8x32xf32>
    %cst_68 = arith.constant dense<0.000000e+00> : vector<8xf32>
    %137 = vector.multi_reduction <add>, %136, %cst_68 [1] : vector<8x32xf32> to vector<8xf32>
    %138 = vector.shape_cast %137 : vector<8xf32> to vector<8x1xf32>
    %139 = arith.mulf %113, %113 : vector<8x32xf32>
    %cst_69 = arith.constant dense<0.000000e+00> : vector<8xf32>
    %140 = vector.multi_reduction <add>, %139, %cst_69 [1] : vector<8x32xf32> to vector<8xf32>
    %141 = vector.shape_cast %140 : vector<8xf32> to vector<8x1xf32>
    %142 = vector.broadcast %138 : vector<8x1xf32> to vector<8x16xf32>
    %143 = vector.broadcast %135 : vector<1x16xf32> to vector<8x16xf32>
    %144 = arith.addf %142, %143 : vector<8x16xf32>
    %cst_70 = arith.constant 2.000000e+00 : f32
    %145 = vector.broadcast %cst_70 : f32 to vector<8x16xf32>
    %146 = arith.mulf %145, %131 : vector<8x16xf32>
    %147 = arith.subf %144, %146 : vector<8x16xf32>
    %148 = vector.broadcast %141 : vector<8x1xf32> to vector<8x16xf32>
    %149 = vector.broadcast %135 : vector<1x16xf32> to vector<8x16xf32>
    %150 = arith.addf %148, %149 : vector<8x16xf32>
    %cst_71 = arith.constant 2.000000e+00 : f32
    %151 = vector.broadcast %cst_71 : f32 to vector<8x16xf32>
    %152 = arith.mulf %151, %132 : vector<8x16xf32>
    %153 = arith.subf %150, %152 : vector<8x16xf32>
    %154 = arith.addf %124, %127 : vector<8x1xf32>
    %155 = vector.broadcast %154 : vector<8x1xf32> to vector<8x16xf32>
    %156 = arith.addf %155, %153 : vector<8x16xf32>
    %cst_72 = arith.constant 0.000000e+00 : f32
    %157 = vector.broadcast %cst_72 : f32 to vector<8x16xf32>
    %158 = arith.maximumf %156, %157 : vector<8x16xf32>
    %159 = arith.addf %124, %130 : vector<8x1xf32>
    %160 = vector.broadcast %159 : vector<8x1xf32> to vector<8x16xf32>
    %161 = arith.addf %160, %147 : vector<8x16xf32>
    %cst_73 = arith.constant 0.000000e+00 : f32
    %162 = vector.broadcast %cst_73 : f32 to vector<8x16xf32>
    %163 = arith.maximumf %161, %162 : vector<8x16xf32>
    %164 = arith.index_cast %101 : i32 to index
    %165 = memref.load %arg1[%164] : memref<4xi32, #tpu.memory_space<smem>>
    %166 = arith.index_cast %101 : i32 to index
    %167 = memref.load %arg2[%166] : memref<4xi32, #tpu.memory_space<smem>>
    %168 = vector.broadcast %165 : i32 to vector<8x1xi32>
    %169 = arith.cmpi slt, %0, %168 : vector<8x1xi32>
    %cst_74 = arith.constant 0x7F800000 : f32
    %170 = vector.shape_cast %169 : vector<8x1xi1> to vector<8x1xi1>
    %171 = vector.broadcast %170 : vector<8x1xi1> to vector<8x16xi1>
    %172 = vector.broadcast %cst_74 : f32 to vector<8x16xf32>
    %173 = arith.select %171, %158, %172 : vector<8x16xi1>, vector<8x16xf32>
    %cst_75 = arith.constant dense<0x7F800000> : vector<16xf32>
    %174 = vector.multi_reduction <minimumf>, %173, %cst_75 [0] : vector<8x16xf32> to vector<16xf32>
    %175 = vector.shape_cast %174 : vector<16xf32> to vector<1x16xf32>
    %cst_76 = arith.constant 0x7F800000 : f32
    %176 = vector.shape_cast %169 : vector<8x1xi1> to vector<8x1xi1>
    %177 = vector.broadcast %176 : vector<8x1xi1> to vector<8x16xi1>
    %178 = vector.broadcast %cst_76 : f32 to vector<8x16xf32>
    %179 = arith.select %177, %163, %178 : vector<8x16xi1>, vector<8x16xf32>
    %cst_77 = arith.constant dense<0x7F800000> : vector<16xf32>
    %180 = vector.multi_reduction <minimumf>, %179, %cst_77 [0] : vector<8x16xf32> to vector<16xf32>
    %181 = vector.shape_cast %180 : vector<16xf32> to vector<1x16xf32>
    %cst_78 = arith.constant 0.000000e+00 : f32
    %182 = vector.broadcast %cst_78 : f32 to vector<1x16xf32>
    %183 = arith.subf %182, %175 : vector<1x16xf32>
    %cst_79 = arith.constant 5.000000e-01 : f32
    %184 = vector.broadcast %cst_79 : f32 to vector<1x16xf32>
    %185 = arith.mulf %183, %184 : vector<1x16xf32>
    %186 = math.exp %185 : vector<1x16xf32>
    %cst_80 = arith.constant 0.000000e+00 : f32
    %187 = vector.broadcast %cst_80 : f32 to vector<1x16xf32>
    %188 = arith.subf %187, %181 : vector<1x16xf32>
    %cst_81 = arith.constant 5.000000e-01 : f32
    %189 = vector.broadcast %cst_81 : f32 to vector<1x16xf32>
    %190 = arith.mulf %188, %189 : vector<1x16xf32>
    %191 = math.exp %190 : vector<1x16xf32>
    %192 = vector.broadcast %167 : i32 to vector<1x16xi32>
    %193 = arith.cmpi slt, %1, %192 : vector<1x16xi32>
    %cst_82 = arith.constant 0.000000e+00 : f32
    %194 = vector.broadcast %cst_82 : f32 to vector<1x16xf32>
    %195 = arith.select %193, %186, %194 : vector<1x16xi1>, vector<1x16xf32>
    %cst_83 = arith.constant 0.000000e+00 : f32
    %196 = vector.broadcast %cst_83 : f32 to vector<1x16xf32>
    %197 = arith.select %193, %191, %196 : vector<1x16xi1>, vector<1x16xf32>
    %198 = tpu.concatenate %97, %195 in 1 : vector<1x16xf32>, vector<1x16xf32> -> vector<1x32xf32>
    %199 = vector.shape_cast %198 : vector<1x32xf32> to vector<1x1x32xf32>
    %c0_84 = arith.constant 0 : index
    %c0_85 = arith.constant 0 : index
    %c0_86 = arith.constant 0 : index
    %200 = vector.load %arg10[%c0_84, %c0_85, %c0_86] : memref<1x1x32xf32, #tpu.memory_space<vmem>>, vector<1x1x32xf32>
    tpu.vector_store %arg10[%c0_84, %c0_85, %c0_86], %199 {strides = array<i32>} : memref<1x1x32xf32, #tpu.memory_space<vmem>>, vector<1x1x32xf32>,
    %201 = tpu.concatenate %99, %197 in 1 : vector<1x16xf32>, vector<1x16xf32> -> vector<1x32xf32>
    %202 = vector.shape_cast %201 : vector<1x32xf32> to vector<1x1x32xf32>
    %c0_87 = arith.constant 0 : index
    %c0_88 = arith.constant 0 : index
    %c0_89 = arith.constant 0 : index
    %203 = vector.load %arg11[%c0_87, %c0_88, %c0_89] : memref<1x1x32xf32, #tpu.memory_space<vmem>>, vector<1x1x32xf32>
    tpu.vector_store %arg11[%c0_87, %c0_88, %c0_89], %202 {strides = array<i32>} : memref<1x1x32xf32, #tpu.memory_space<vmem>>, vector<1x1x32xf32>,
    return
  }
  func.func @transform_0(%arg0: i32, %arg1: memref<4xi32, #tpu.memory_space<smem>>, %arg2: memref<4xi32, #tpu.memory_space<smem>>) -> (i32, i32, i32) {
    %c0_i32 = arith.constant 0 : i32
    %c0_i32_0 = arith.constant 0 : i32
    %c0_i32_1 = arith.constant 0 : i32
    return %arg0, %c0_i32, %c0_i32_0 : i32, i32, i32
  }
  func.func @transform_1(%arg0: i32, %arg1: memref<4xi32, #tpu.memory_space<smem>>, %arg2: memref<4xi32, #tpu.memory_space<smem>>) -> (i32, i32, i32) {
    %c0_i32 = arith.constant 0 : i32
    %c0_i32_0 = arith.constant 0 : i32
    %c0_i32_1 = arith.constant 0 : i32
    return %arg0, %c0_i32, %c0_i32_0 : i32, i32, i32
  }
  func.func @transform_2(%arg0: i32, %arg1: memref<4xi32, #tpu.memory_space<smem>>, %arg2: memref<4xi32, #tpu.memory_space<smem>>) -> (i32, i32, i32) {
    %c0_i32 = arith.constant 0 : i32
    %c0_i32_0 = arith.constant 0 : i32
    %c0_i32_1 = arith.constant 0 : i32
    return %arg0, %c0_i32, %c0_i32_0 : i32, i32, i32
  }
  func.func @transform_3(%arg0: i32, %arg1: memref<4xi32, #tpu.memory_space<smem>>, %arg2: memref<4xi32, #tpu.memory_space<smem>>) -> (i32, i32, i32) {
    %c0_i32 = arith.constant 0 : i32
    %c0_i32_0 = arith.constant 0 : i32
    %c0_i32_1 = arith.constant 0 : i32
    return %arg0, %c0_i32, %c0_i32_0 : i32, i32, i32
  }
  func.func @transform_4(%arg0: i32, %arg1: memref<4xi32, #tpu.memory_space<smem>>, %arg2: memref<4xi32, #tpu.memory_space<smem>>) -> (i32, i32, i32) {
    %c0_i32 = arith.constant 0 : i32
    %c0_i32_0 = arith.constant 0 : i32
    %c0_i32_1 = arith.constant 0 : i32
    return %arg0, %c0_i32, %c0_i32_0 : i32, i32, i32
  }
  func.func @transform_5(%arg0: i32, %arg1: memref<4xi32, #tpu.memory_space<smem>>, %arg2: memref<4xi32, #tpu.memory_space<smem>>) -> (i32, i32, i32) {
    %c0_i32 = arith.constant 0 : i32
    %c0_i32_0 = arith.constant 0 : i32
    %c0_i32_1 = arith.constant 0 : i32
    return %arg0, %c0_i32, %c0_i32_0 : i32, i32, i32
  }
  func.func @transform_6(%arg0: i32, %arg1: memref<4xi32, #tpu.memory_space<smem>>, %arg2: memref<4xi32, #tpu.memory_space<smem>>) -> (i32, i32, i32) {
    %c0_i32 = arith.constant 0 : i32
    %c0_i32_0 = arith.constant 0 : i32
    %c0_i32_1 = arith.constant 0 : i32
    return %arg0, %c0_i32, %c0_i32_0 : i32, i32, i32
  }
  func.func @transform_7(%arg0: i32, %arg1: memref<4xi32, #tpu.memory_space<smem>>, %arg2: memref<4xi32, #tpu.memory_space<smem>>) -> (i32, i32, i32) {
    %c0_i32 = arith.constant 0 : i32
    %c0_i32_0 = arith.constant 0 : i32
    %c0_i32_1 = arith.constant 0 : i32
    return %arg0, %c0_i32, %c0_i32_0 : i32, i32, i32
  }
  func.func @transform_8(%arg0: i32, %arg1: memref<4xi32, #tpu.memory_space<smem>>, %arg2: memref<4xi32, #tpu.memory_space<smem>>) -> (i32, i32, i32) {
    %c0_i32 = arith.constant 0 : i32
    %c0_i32_0 = arith.constant 0 : i32
    %c0_i32_1 = arith.constant 0 : i32
    return %arg0, %c0_i32, %c0_i32_0 : i32, i32, i32
  }
}

</mosaic_0001>

<bundles_post_ra>
// kernel: tpu_custom_call.1
= control target key start
LH: loop header
LB: loop body
LE: loop exit
PB: predicated region body
PF: predicated region fallthrough
CT: control target
= control target key end

     0   :  { %s1813_s0 = inlined_call_operand.vmem [shape: s32[4], index: 0, kind: input, shape index: {}]   ;;  %s1814_s2 = inlined_call_operand.vmem [shape: f32[4,1,32], index: 2, kind: input, shape index: {}]   ;;  %s1815_s3 = inlined_call_operand.vmem [shape: f32[4,1,32], index: 3, kind: input, shape index: {}]   ;;  %s1816_s4 = inlined_call_operand.vmem [shape: f32[4,1,32], index: 4, kind: input, shape index: {}]   ;;  %s1817_s5 = inlined_call_operand.vmem [shape: f32[4,8,32], index: 5, kind: input, shape index: {}]   ;;  %s1818_s6 = inlined_call_operand.vmem [shape: f32[4,8,32], index: 6, kind: input, shape index: {}]   ;;  %s1819_s7 = inlined_call_operand.vmem [shape: f32[4,8,32], index: 7, kind: input, shape index: {}]   ;;  %s1820_s8 = inlined_call_operand.vmem [shape: f32[4,32,16], index: 8, kind: input, shape index: {}]   ;;  %s1821_s9 = inlined_call_operand.hbm [shape: f32[2,1,32], index: 9, kind: output, shape index: {0}]   ;;  %s1822_s10 = inlined_call_operand.hbm [shape: f32[2,1,32], index: 10, kind: output, shape index: {1}]   ;;  %s1823_s1 = inlined_call_operand.vmem [shape: s32[4], index: 1, kind: input, shape index: {}]  }
   0x1   :  { %1825 = sst [smem:[#allocation12_spill]] %s1820_s8  ;;  %s16_s15 = sshll.u32 %s1813_s0, 4  ;;  %s17_s15 = int_to_ptr.vmem [resolvable:$true] %s16_s15 }
   0x2   :  { %s20_s18 = sshll.u32 %s1823_s1, 4  ;;  %s1340_s19 = scalar_lea.vmem %s17_s15, 16  ;;  %s21_s18 = int_to_ptr.vmem [resolvable:$true] %s20_s18 }
   0x3   :  { %p1341_p0 = scmp.ne.s32.totalorder %s17_s15, %s1340_s19  ;;  %p1345_p1 = scmp.lt.s32.totalorder %s17_s15, %s17_s15 }
   0x4   :  { %p1346_p2 = scmp.lt.s32.totalorder %s1340_s19, %s1340_s19 }
   0x6   :  { %p1347_p3 = por %p1346_p2, %p1345_p1 }
   0x8   :  { %p1348_p4 = pnand %p1347_p3, %p1341_p0 }
   0xa   :  { %1351 = shalt.err (!%p1348_p4)  }
   0xb   :  { %s1458_s20 = smov [#allocation3]   ;;  %s1352_s21 = scalar_lea.vmem %s21_s18, 16 }
   0xc   :  { %19 = dma.vmem_to_smem %s17_s15, 16, %s1458_s20, [#allocation2] }
   0xd   :  { %p1353_p5 = scmp.ne.s32.totalorder %s21_s18, %s1352_s21  ;;  %p1357_p6 = scmp.lt.s32.totalorder %s21_s18, %s21_s18 }
   0xe   :  { %p1358_p7 = scmp.lt.s32.totalorder %s1352_s21, %s1352_s21 }
  0x10   :  { %p1359_p8 = por %p1358_p7, %p1357_p6 }
  0x12   :  { %p1360_p9 = pnand %p1359_p8, %p1353_p5 }
  0x14   :  { %1363 = shalt.err (!%p1360_p9)  }
  0x15   :  { %s1459_s0 = smov [#allocation4]  }
  0x16   :  { %23 = dma.vmem_to_smem %s21_s18, 16, %s1459_s0, [#allocation2] }
  0x17   :  { %1432 = dma.done.wait [#allocation2], 32 }
  0x18   :  { %1433 = vsyncadd [#allocation2], 4294967264 }
  0x19   :  { %25 = sfence }
  0x1a   :  { %26 = vsyncpa [#allocation6], 0 }
  0x1b   :  { %28 = vsyncpa [#allocation6 + $0x1], 0 }
  0x1c   :  { %29 = vsyncpa [#allocation8], 0 }
  0x1d   :  { %31 = vsyncpa [#allocation8 + $0x1], 0  ;;  %s1526_s1 = smov 0   ;;  %s1528_s22 = smov 0  }
  0x1e   :  { %s1530_s23 = smov 0   ;;  %s1532_s24 = smov 0  }
  0x1f LB: > { %s1547_s25 = sadd.s32 4294967295, %s1456_s24   ;;  %s1177_s26 = sadd.s32 4294967294, %s1456_s24   ;;  %s1456_s24 = sphi %s1532_s24, %s1835_s24   ;;  %s1452_s23 = sphi %s1530_s23, %s1834_s23   ;;  %s1448_s22 = sphi %s1528_s22, %s1833_s22   ;;  %s1444_s1 = sphi %s1526_s1, %s1832_s1  }
  0x20   : > { %s1551_s27 = sadd.s32 1, %s1456_s24   ;;  %s226_s28 = sadd.s32 1, %s1452_s23 }
  0x21   : > { %s223_s29 = ssub.s32 %s1456_s24, %s1551_s27  ;;  %p236_p10 = scmp.ne.s32.totalorder %s1452_s23, %s1448_s22 }
  0x22   : > { %p224_p11 = scmp.eq.s32.totalorder %s223_s29, 0  ;;  %p237_p12 = scmp.eq.s32.totalorder %s1547_s25, 1 }
  0x23   : > { %p242_p13 = scmp.ne.s32.totalorder %s1448_s22, %s1444_s1  ;;  %p243_p0 = scmp.eq.s32.totalorder %s1177_s26, 1 }
  0x24   : > { %s1562_s30 = scalar_select %p224_p11, %s1452_s23, %s226_s28  }
  0x25   : > { %p1564_p1 = por %p237_p12, %p236_p10  ;;  %p1568_p2 = por %p243_p0, %p242_p13 }
  0x26   : > { %p1180_p3 = scmp.ge.s32.totalorder %s1456_s24, 1  ;;  %p348_p4 = scmp.lt.s32.totalorder %s1456_s24, 3 }
  0x28   : > { %p349_p5 = pnand %p1180_p3, %p348_p4 }
  0x29   : > { %s1575_s13 = sshll.u32 (!%p349_p5), %s1547_s25, 1  ;;  %s1828_s8 = sld [smem:[#allocation12_spill]] (!%p349_p5) }
  0x2a   : > { %352 = sbr.rel (%p349_p5) target bundleno = 456 (0x1c8), region = 48  ;;  %p414_p6 = scmp.lt.s32.totalorder (!%p349_p5), %s1575_s13, 3 }
  0x2b   : > { %s687_s17 = sld [smem:[#allocation4 + %s1575_s13]] (!%p349_p5)  ;;  %s1727_s20 = sand.u32 (!%p349_p5), 1, %s1448_s22  }
  0x2f   : > { %v1460_v0 = vmov 0.0   ;;  %vm1461_vm0 = vmmov 0   ;;  %s1585_s14 = scalar_select %p414_p6, %s1575_s13, 3  ;;  %vm652_vm1 = vcmask 130048   ;;  %vm490_vm2 = vcmask 261120  }
  0x30   : > { %1239 = vmatprep.subr.mxu0 %v1460_v0  ;;  %1250 = vmatprep.subr.mxu1 %v1460_v0  ;;  %vm993_vm7 = vcmask 253952  }
  0x31   : > { %1247 = vmatprep.mubr.msk.f32.mxu0 %vm1461_vm0, %v1460_v0  ;;  %1258 = vmatprep.mubr.msk.f32.mxu1 %vm1461_vm0, %v1460_v0  ;;  %s1218_s15 = sshll.u32 %s1585_s14, 5  ;;  %s1185_s16 = sshll.u32 %s1585_s14, 3 }
  0x32   : > { %s451_s19 = scalar_lea.vmem %s1828_s8, %s1218_s15  ;;  %s1599_s0 = scalar_lea.vmem %s1818_s6, %s1185_s16 }
  0x33   : > { %v1592_v1 = vld [vmem:[%s451_s19 + $0x18] sm:$0xff]  ;;  %v466_v2 = vld [vmem:[%s451_s19 + $0x10] sm:$0xff]  ;;  %v465_v3 = vld [vmem:[%s451_s19 + $0x8] sm:$0xff]  ;;  %s1604_s29 = scalar_lea.vmem %s1819_s7, %s1185_s16  ;;  %s1612_s18 = scalar_lea.vmem %s1814_s2, %s1585_s14 }
  0x34   : > { %1240 = vmatpush3.msra.mxu0 %v1592_v1  ;;  %1251 = vmatpush3.msra.mxu1 %v1592_v1  ;;  %v650_v4 = vmul.f32 %v466_v2, %v466_v2  ;;  %v649_v5 = vmul.f32 %v465_v3, %v465_v3  ;;  %v464_v6 = vld [vmem:[%s451_s19] sm:$0xff]  ;;  %s1617_s21 = scalar_lea.vmem %s1817_s5, %s1185_s16  ;;  %v1207_v10 = vld [vmem:[%s451_s19 + $0x30] sm:$0xff]  ;;  %v1206_v11 = vld [vmem:[%s451_s19 + $0x28] sm:$0xff]  ;;  %s1658_s15 = scalar_lea.vmem %s1816_s4, %s1585_s14 }
  0x35   : > { %1241 = vmatprep.subr.mxu0 %v1460_v0  ;;  %1252 = vmatprep.subr.mxu1 %v1460_v0  ;;  %v648_v7 = vmul.f32 %v464_v6, %v464_v6  ;;  %v1205_v12 = vld [vmem:[%s451_s19 + $0x20] sm:$0xff]  ;;  %v1208_v15 = vld [vmem:[%s451_s19 + $0x38] sm:$0xff]  ;;  %v919_v16 = vmul.f32 %v1207_v10, %v1207_v10  ;;  %v918_v17 = vmul.f32 %v1206_v11, %v1206_v11  ;;  %v1202_v23 = vld [vmem:[%s1617_s21 + $0x8] sm:$0xff]  ;;  %s1640_s19 = scalar_lea.vmem %s1815_s3, %s1585_s14  ;;  %s686_s14 = sld [smem:[#allocation3 + %s1575_s13]] }
  0x36   : > { %1242 = vmatpush3.msra.mxu0 %v466_v2  ;;  %v656_v8 = vsel %vm652_vm1, %v650_v4, 0.0  ;;  %1253 = vmatpush3.msra.mxu1 %v466_v2  ;;  %v654_v9 = vsel %vm652_vm1, %v649_v5, 0.0  ;;  %v1625_v14 = vld [vmem:[%s1599_s0] sm:$0xff]  ;;  %v917_v18 = vmul.f32 %v1205_v12, %v1205_v12  ;;  %v920_v21 = vmul.f32 %v1208_v15, %v1208_v15  ;;  %v1203_v32 = vld [vmem:[%s1599_s0 + $0x8] sm:$0xff]  ;;  %s720_s0 = sadd.s32 1, %s1575_s13  ;;  %s1462_s13 = smov 16  }
  0x37   : > { %1243 = vmatprep.subr.mxu0 %v1460_v0  ;;  %1254 = vmatprep.subr.mxu1 %v1460_v0  ;;  %v653_v13 = vsel %vm652_vm1, %v648_v7, 0.0  ;;  %v1628_v20 = vld [vmem:[%s1604_s29] sm:$0xff]  ;;  %v922_v24 = vsel %vm652_vm1, %v918_v17, 0.0  ;;  %v924_v27 = vsel %vm652_vm1, %v919_v16, 0.0  ;;  %v934_v34 = vmul.f32 %v1203_v32, %v1203_v32  ;;  %v1204_v39 = vld [vmem:[%s1604_s29 + $0x8] sm:$0xff]  ;;  %s1707_s29 = sld [smem:[#allocation3 + %s720_s0]] }
  0x38   : > { %1244 = vmatpush3.msra.mxu0 %v465_v3  ;;  %1255 = vmatpush3.msra.mxu1 %v465_v3  ;;  %v655_v19 = vadd.f32 %v654_v9, %v653_v13  ;;  %v1209_v22 = vld [vmem:[%s1612_s18 + $0x1] ss:$0 sm:$0xff]  ;;  %v921_v25 = vsel %vm652_vm1, %v917_v18, 0.0  ;;  %v926_v30 = vsel %vm652_vm1, %v920_v21, 0.0  ;;  %v938_v42 = vmul.f32 %v1204_v39, %v1204_v39  ;;  %v1194_v45 = vld [vmem:[%s1612_s18] ss:$0 sm:$0xff] }
  0x39   : > { %1245 = vmatprep.subr.mxu0 %v1460_v0  ;;  %1256 = vmatprep.subr.mxu1 %v1460_v0  ;;  %v923_v28 = vadd.f32 %v922_v24, %v921_v25  ;;  %v744_v29 = vsub.f32 %v1202_v23, %v1209_v22  ;;  %v1210_v31 = vld [vmem:[%s1640_s19 + $0x1] ss:$0 sm:$0xff]  ;;  %v935_v40 = vsel %vm490_vm2, %v934_v34, 0.0  ;;  %v666_v47 = vmul.f32 %v1625_v14, %v1625_v14  ;;  %v1195_v52 = vld [vmem:[%s1640_s19] ss:$0 sm:$0xff]  ;;  %s955_s18 = sld [smem:[#allocation4 + %s720_s0]] }
  0x3a   : > { %1246 = vmatpush3.msra.mxu0 %v464_v6  ;;  %v1642_v26 = vadd.f32 %v656_v8, %v655_v19  ;;  %1257 = vmatpush3.msra.mxu1 %v464_v6  ;;  %v751_v36 = vsub.f32 %v1203_v32, %v1210_v31  ;;  %v1211_v38 = vld [vmem:[%s1658_s15 + $0x1] ss:$0 sm:$0xff]  ;;  %v939_v48 = vsel %vm490_vm2, %v938_v42, 0.0  ;;  %v1196_v53 = vld [vmem:[%s1658_s15] ss:$0 sm:$0xff]  ;;  %v670_v55 = vmul.f32 %v1628_v20, %v1628_v20  ;;  %s406_s8 = scalar_lea.vmem [#allocation5], %s1727_s20 }
  0x3b   : > { %1248 = vmatmul.mubr.msk.f32.vlgmr.msra.gmra.mxu0 %vm490_vm2, %v1625_v14  ;;  %1259 = vmatmul.mubr.msk.f32.vlgmr.msra.gmra.mxu1 %vm490_vm2, %v1628_v20  ;;  %v925_v33 = vadd.f32 %v924_v27, %v923_v28  ;;  %v759_v35 = vmul.f32 %v744_v29, %v744_v29  ;;  %v758_v44 = vsub.f32 %v1204_v39, %v1211_v38  ;;  %v461_v46 = vld [vmem:[%s1617_s21] sm:$0xff]  ;;  %v667_v54 = vsel %vm490_vm2, %v666_v47, 0.0  ;;  %s1214_s21 = sshll.u32 %s1547_s25, 4  ;;  %s1018_s16 = sshll.u32 %s406_s8, 4  ;;  %s1739_s16 = int_to_ptr.vmem [resolvable:$true] %s1018_s16 }
  0x3c   : > { %1261 = vmatprep.subr.mxu0 %v1460_v0  ;;  %1272 = vmatprep.subr.mxu1 %v1460_v0  ;;  %v763_v43 = vmul.f32 %v751_v36, %v751_v36  ;;  %v474_v51 = vsub.f32 %v461_v46, %v1194_v45  ;;  %v481_v58 = vsub.f32 %v1625_v14, %v1195_v52  ;;  %v671_v60 = vsel %vm490_vm2, %v670_v55, 0.0  ;;  %s1824_s19 = scalar_lea.vmem [#allocation7], %s1727_s20 }
  0x3d   : > { %1262 = vmatpush3.msra.mxu0 %v1208_v15  ;;  %1273 = vmatpush3.msra.mxu1 %v1208_v15  ;;  %v1662_v37 = vadd.f32 %v926_v30, %v925_v33  ;;  %v760_v41 = vsel %vm490_vm2, %v759_v35, 0.0  ;;  %v767_v50 = vmul.f32 %v758_v44, %v758_v44  ;;  %v488_v59 = vsub.f32 %v1628_v20, %v1196_v53  ;;  %s1031_s26 = sshll.u32 %s1824_s19, 4  ;;  %s1747_s26 = int_to_ptr.vmem [resolvable:$true] %s1031_s26 }
  0x3e   : > { %1263 = vmatprep.subr.mxu0 %v1460_v0  ;;  %1274 = vmatprep.subr.mxu1 %v1460_v0  ;;  %v764_v49 = vsel %vm490_vm2, %v763_v43, 0.0  ;;  %v489_v57 = vmul.f32 %v474_v51, %v474_v51  ;;  %v494_v62 = vmul.f32 %v481_v58, %v481_v58  ;;  %v453_v23 = vlaneseq }
  0x3f   : > { %1264 = vmatpush3.msra.mxu0 %v1207_v10  ;;  %1275 = vmatpush3.msra.mxu1 %v1207_v10  ;;  %v768_v56 = vsel %vm490_vm2, %v767_v50, 0.0  ;;  %v498_v63 = vmul.f32 %v488_v59, %v488_v59 }
  0x40   : > { %1265 = vmatprep.subr.mxu0 %v1460_v0  ;;  %1276 = vmatprep.subr.mxu1 %v1460_v0  ;;  %v491_v61 = vsel %vm490_vm2, %v489_v57, 0.0  ;;  %v495_v2 = vsel %vm490_vm2, %v494_v62, 0.0  ;;  %v956_v62 = vstv %s1707_s29  ;;  %s1745_s29 = scalar_lea.hbm %s1822_s10, %s1214_s21 }
  0x41   : > { %1266 = vmatpush3.msra.mxu0 %v1206_v11  ;;  %1277 = vmatpush3.msra.mxu1 %v1206_v11  ;;  %v499_v3 = vsel %vm490_vm2, %v498_v63, 0.0 }
  0x42   : > { %1267 = vmatprep.subr.mxu0 %v1460_v0  ;;  %1278 = vmatprep.subr.mxu1 %v1460_v0 }
  0x43   : > { %1268 = vmatpush3.msra.mxu0 %v1205_v12  ;;  %1269 = vmatprep.mubr.msk.f32.mxu0 %vm1461_vm0, %v1460_v0 }
  0x44   : > { %1279 = vmatpush3.msra.mxu1 %v1205_v12  ;;  %1280 = vmatprep.mubr.msk.f32.mxu1 %vm1461_vm0, %v1460_v0  ;;  %v651_v0 = vmul.f32 %v1592_v1, %v1592_v1  ;;  %v928_v12 = vrot.slane %v1662_v37, 4 }
  0x45   : > { %1270 = vmatmul.mubr.msk.f32.vlgmr.msra.gmra.mxu0 %vm490_vm2, %v1203_v32  ;;  %1281 = vmatmul.mubr.msk.f32.vlgmr.msra.gmra.mxu1 %vm490_vm2, %v1204_v39 }
  0x46   : > { %936 = vadd.xlane.f32.xlu0 %v935_v40  ;;  %761 = vadd.xlane.f32.xlu1 %v760_v41  ;;  %v658_v4 = vsel %vm652_vm1, %v651_v0, 0.0  ;;  %v929_v16 = vadd.f32 %v928_v12, %v1662_v37  ;;  %v454_v37 = vshrl.u32 %v453_v23, 7  ;;  %v688_v40 = vstv %s686_s14  ;;  %s1737_s14 = scalar_lea.hbm %s1821_s9, %s1214_s21 }
  0x47   : > { %v659_v5 = vadd.f32 %v658_v4, %v1642_v26 }
  0x48   : > { %v930_v20 = vrot.slane %v929_v16, 2  ;;  %vm689_vm3 = vcmp.lt.s32.totalorder %v454_v37, %v688_v40  ;;  %vm957_vm4 = vcmp.lt.s32.totalorder %v454_v37, %v956_v62 }
  0x49   : > { %v660_v8 = vrot.slane %v659_v5, 4 }
  0x4a   : > { %940 = vadd.xlane.f32.xlu0 %v939_v48  ;;  %765 = vadd.xlane.f32.xlu1 %v764_v49  ;;  %v931_v22 = vadd.f32 %v930_v20, %v929_v16 }
  0x4b   : > { %v661_v9 = vadd.f32 %v660_v8, %v659_v5 }
  0x4c   : > { %v932_v34 = vrot.slane %v931_v22, 1 }
  0x4d   : > { %v662_v1 = vrot.slane %v661_v9, 2 }
  0x4e   : > { %769 = vadd.xlane.f32.xlu0 %v768_v56  ;;  %668 = vadd.xlane.f32.xlu1 %v667_v54  ;;  %v933_v43 = vadd.f32 %v932_v34, %v931_v22 }
  0x4f   : > { %v663_v15 = vadd.f32 %v662_v1, %v661_v9 }
  0x51   : > { %v664_v17 = vrot.slane %v663_v15, 1 }
  0x52   : > { %672 = vadd.xlane.f32.xlu0 %v671_v60  ;;  %492 = vadd.xlane.f32.xlu1 %v491_v61 }
  0x53   : > { %v665_v21 = vadd.f32 %v664_v17, %v663_v15 }
  0x56   : > { %496 = vadd.xlane.f32.xlu0 %v495_v2  ;;  %500 = vadd.xlane.f32.xlu1 %v499_v3 }
  0xcf   : > { %v937_v6 = vpop.xlane.xlu0 %936  ;;  %v762_v7 = vpop.xlane.xlu1 %761 }
  0xd0   : > { %v942_v48 = vadd.f32 %v937_v6, %v933_v43 }
  0xd3   : > { %v941_v10 = vpop.xlane.xlu0 %940  ;;  %v766_v11 = vpop.xlane.xlu1 %765 }
  0xd4   : > { %v945_v49 = vadd.f32 %v941_v10, %v933_v43  ;;  %v948_v58 = vadd.f32 %v766_v11, %v762_v7 }
  0xd7   : > { %v770_v13 = vpop.xlane.xlu0 %769  ;;  %v669_v14 = vpop.xlane.xlu1 %668 }
  0xd8   : > { %v674_v26 = vadd.f32 %v669_v14, %v665_v21  ;;  %v951_v59 = vadd.f32 %v770_v13, %v762_v7 }
  0xdb   : > { %v673_v18 = vpop.xlane.xlu0 %672  ;;  %v493_v19 = vpop.xlane.xlu1 %492 }
  0xdc   : > { %v677_v27 = vadd.f32 %v673_v18, %v665_v21 }
  0xdf   : > { %v497_v24 = vpop.xlane.xlu0 %496  ;;  %v501_v25 = vpop.xlane.xlu1 %500 }
  0xe0   : > { %v680_v32 = vadd.f32 %v497_v24, %v493_v19  ;;  %v683_v33 = vadd.f32 %v501_v25, %v493_v19 }
  0xfb   : > { %v571_v28 = vpop.f32.mrf.mxu0  ;;  %v644_v29 = vpop.f32.mrf.mxu1 }
  0xfc   : > { %v675_v30 = vmul.f32 2.0, %v571_v28  ;;  %v678_v31 = vmul.f32 2.0, %v644_v29 }
  0xfd   : > { %v1249_v35 = vpop.f32.mrf.mxu0  ;;  %v1260_v36 = vpop.f32.mrf.mxu1 }
  0xfe   : > { %v676_v38 = vsub.f32 %v674_v26, %v675_v30  ;;  %v679_v39 = vsub.f32 %v677_v27, %v678_v31 }
 0x100   : > { %v681_v41 = vadd.f32 %v680_v32, %v679_v39  ;;  %v684_v42 = vadd.f32 %v683_v33, %v676_v38 }
 0x102   : > { %v682_v44 = vmax.f32 %v681_v41, 0.0  ;;  %v685_v45 = vmax.f32 %v684_v42, 0.0  ;;  %v456_v42 = vand.u32 127, %v453_v23 }
 0x104   : > { %v692_v46 = vsel %vm689_vm3, %v682_v44, inf  ;;  %v700_v47 = vsel %vm689_vm3, %v685_v45, inf  ;;  %v716_v45 = vstv %s687_s17  ;;  %s1002_s17 = scalar_lea.sflag [#allocation6], %s1727_s20 }
 0x105   : > { %v693_v50 = vsel %vm652_vm1, %v692_v46, inf  ;;  %v701_v51 = vsel %vm652_vm1, %v700_v47, inf  ;;  %v840_v52 = vpop.f32.mrf.mxu0  ;;  %v913_v53 = vpop.f32.mrf.mxu1  ;;  %vm1718_vm5 = vcmp.lt.s32.totalorder %v456_v42, %v716_v45 }
 0x106   : > { %v694_v54 = vrot.slane %v693_v50, 4  ;;  %v702_v55 = vrot.slane %v701_v51, 4  ;;  %v943_v56 = vmul.f32 2.0, %v840_v52  ;;  %v946_v57 = vmul.f32 2.0, %v913_v53 }
 0x107   : > { %v1271_v60 = vpop.f32.mrf.mxu0  ;;  %v1282_v61 = vpop.f32.mrf.mxu1 }
 0x108   : > { %v695_v63 = vmin.f32 %v693_v50, %v694_v54  ;;  %v703_v0 = vmin.f32 %v701_v51, %v702_v55  ;;  %v944_v2 = vsub.f32 %v942_v48, %v943_v56  ;;  %v947_v3 = vsub.f32 %v945_v49, %v946_v57 }
 0x109   : > { %v984_v50 = vstv %s955_s18  ;;  %s1364_s18 = scalar_lea.vmem %s1739_s16, 16 }
 0x10a   : > { %v696_v4 = vrot.slane %v695_v63, 2  ;;  %v704_v5 = vrot.slane %v703_v0, 2  ;;  %v952_v6 = vadd.f32 %v951_v59, %v944_v2  ;;  %v949_v8 = vadd.f32 %v948_v58, %v947_v3  ;;  %p1365_p7 = scmp.ne.s32.totalorder %s1739_s16, %s1364_s18 }
 0x10b   : > { %vm985_vm6 = vcmp.lt.s32.totalorder %v456_v42, %v984_v50 }
 0x10c   : > { %v697_v9 = vmin.f32 %v695_v63, %v696_v4  ;;  %v705_v10 = vmin.f32 %v703_v0, %v704_v5  ;;  %v953_v1 = vmax.f32 %v952_v6, 0.0  ;;  %v950_v12 = vmax.f32 %v949_v8, 0.0  ;;  %p1366_p8 = pnand %p1365_p7, %p1564_p1 }
 0x10e   : > { %v698_v14 = vrot.slane %v697_v9, 1  ;;  %v706_v15 = vrot.slane %v705_v10, 1  ;;  %v960_v11 = vsel %vm957_vm4, %v950_v12, inf  ;;  %v968_v7 = vsel %vm957_vm4, %v953_v1, inf  ;;  %p1367_p9 = pneg %p1366_p8 }
 0x10f   : > { %v961_v13 = vsel %vm652_vm1, %v960_v11, inf  ;;  %v969_v16 = vsel %vm652_vm1, %v968_v7, inf }
 0x110   : > { %v699_v17 = vmin.f32 %v697_v9, %v698_v14  ;;  %v707_v18 = vmin.f32 %v705_v10, %v706_v15  ;;  %v962_v19 = vrot.slane %v961_v13, 4  ;;  %v970_v20 = vrot.slane %v969_v16, 4 }
 0x112   : > { %v708_v21 = vsub.f32 0.0, %v699_v17  ;;  %v712_v22 = vsub.f32 0.0, %v707_v18  ;;  %v963_v24 = vmin.f32 %v961_v13, %v962_v19  ;;  %v971_v25 = vmin.f32 %v969_v16, %v970_v20 }
 0x114   : > { %v709_v26 = vmul.f32 0.5, %v708_v21  ;;  %v713_v27 = vmul.f32 0.5, %v712_v22  ;;  %v964_v28 = vrot.slane %v963_v24, 2  ;;  %v972_v29 = vrot.slane %v971_v25, 2 }
 0x116   : > { %v710_v30 = vmul.f32 1.442695, %v709_v26  ;;  %v714_v31 = vmul.f32 1.442695, %v713_v27  ;;  %v965_v32 = vmin.f32 %v963_v24, %v964_v28  ;;  %v973_v33 = vmin.f32 %v971_v25, %v972_v29 }
 0x118   : > { %1332 = vpow2.f32 %v710_v30  ;;  %v966_v34 = vrot.slane %v965_v32, 1  ;;  %v974_v35 = vrot.slane %v973_v33, 1 }
 0x119   : > { %1334 = vpow2.f32 %v714_v31 }
 0x11a   : > { %v967_v36 = vmin.f32 %v965_v32, %v966_v34  ;;  %v975_v37 = vmin.f32 %v973_v33, %v974_v35 }
 0x11c   : > { %v976_v38 = vsub.f32 0.0, %v967_v36  ;;  %v980_v39 = vsub.f32 0.0, %v975_v37 }
 0x11e   : > { %v977_v40 = vmul.f32 0.5, %v976_v38  ;;  %v981_v41 = vmul.f32 0.5, %v980_v39 }
 0x120   : > { %v978_v43 = vmul.f32 1.442695, %v977_v40  ;;  %v982_v44 = vmul.f32 1.442695, %v981_v41 }
 0x122   : > { %1336 = vpow2.f32 %v978_v43 }
 0x123   : > { %1338 = vpow2.f32 %v982_v44 }
 0x125   : > { %v1333_v47 = vpop.eup %1332 }
 0x126   : > { %v1335_v48 = vpop.eup %1334  ;;  %v718_v49 = vsel %vm1718_vm5, %v1333_v47, 0.0 }
 0x127   : > { %v719_v23 = vsel %vm1718_vm5, %v1335_v48, 0.0 }
 0x12f   : > { %v1337_v51 = vpop.eup %1336 }
 0x130   : > { %v1339_v52 = vpop.eup %1338  ;;  %v986_v53 = vsel %vm985_vm6, %v1337_v51, 0.0 }
 0x131   : > { %989 = vrot.lane.b32.xlu0 %v986_v53, %s1462_s13  ;;  %v987_v54 = vsel %vm985_vm6, %v1339_v52, 0.0 }
 0x132   : > { %996 = vrot.lane.b32.xlu1 %v987_v54, %s1462_s13  ;;  %s1463_s13 = smov [#allocation5]  }
 0x133   : > { %s1368_s28 = sshll.u32 %s1463_s13, 4  ;;  %s1369_s28 = int_to_ptr.vmem [resolvable:$false] %s1368_s28 }
 0x134   : > { %s1370_s15 = scalar_lea.vmem %s1369_s28, 32  ;;  %p1371_p10 = scmp.lt.s32.totalorder %s1739_s16, %s1369_s28 }
 0x135   : > { %p1372_p11 = scmp.lt.s32.totalorder %s1370_s15, %s1364_s18 }
 0x137   : > { %p1373_p12 = por %p1372_p11, %p1371_p10 }
 0x139   : > { %p1374_p13 = pnand %p1373_p12, %p1367_p9 }
 0x1a3   : > { %v990_v55 = vpop.permute.xlu0 %989 }
 0x1a4   : > { %v992_v56 = vsel %vm652_vm1, %v718_v49, %v990_v55  ;;  %v997_v57 = vpop.permute.xlu1 %996 }
 0x1a5   : > { %v999_v58 = vsel %vm652_vm1, %v719_v23, %v997_v57  ;;  %994 = vst.msk [vmem:[%s406_s8] sm:$0x1] %vm993_vm7, %v992_v56 }
 0x1a6   : > { %1377 = shalt.err (!%p1374_p13)
}
 0x1a7   : > { %s1378_s21 = scalar_lea.hbm %s1737_s14, 16  ;;  %s1382_s0 = scalar_lea.hbm %s1821_s9, 32 }
 0x1a8   : > { %p1379_p0 = scmp.ne.s32.totalorder %s1737_s14, %s1378_s21  ;;  %p1383_p5 = scmp.lt.s32.totalorder %s1737_s14, %s1821_s9 }
 0x1a9   : > { %p1384_p6 = scmp.lt.s32.totalorder %s1382_s0, %s1378_s21 }
 0x1aa   : > { %p1380_p3 = pnand %p1379_p0, %p1564_p1 }
 0x1ab   : > { %p1385_p7 = por %p1384_p6, %p1383_p5 }
 0x1ac   : > { %p1381_p4 = pneg %p1380_p3 }
 0x1ae   : > { %p1386_p8 = pnand %p1385_p7, %p1381_p4 }
 0x1b0   : > { %1389 = shalt.err (!%p1386_p8)
}
 0x1b1   : > { %1283 = dma.vmem_to_hbm [thread:$0]  (%p1564_p1), %s1739_s16, 16, %s1737_s14, %s1002_s17  }
 0x1b2   : > { %s1831_s18 = scalar_lea.vmem [#allocation7], %s1727_s20  ;;  %s1006_s19 = scalar_lea.sflag [#allocation8], %s1727_s20 }
 0x1b3   : > { %1000 = vst.msk [vmem:[%s1831_s18] sm:$0x1] %vm993_vm7, %v999_v58  ;;  %s1390_s28 = scalar_lea.vmem %s1747_s26, 16  ;;  %s1464_s15 = smov [#allocation7]  }
 0x1b4   : > { %p1391_p9 = scmp.ne.s32.totalorder %s1747_s26, %s1390_s28  ;;  %s1394_s21 = sshll.u32 %s1464_s15, 4  ;;  %s1395_s21 = int_to_ptr.vmem [resolvable:$false] %s1394_s21 }
 0x1b5   : > { %s1396_s8 = scalar_lea.vmem %s1395_s21, 32  ;;  %p1397_p12 = scmp.lt.s32.totalorder %s1747_s26, %s1395_s21 }
 0x1b6   : > { %p1392_p10 = pnand %p1391_p9, %p1564_p1  ;;  %p1398_p13 = scmp.lt.s32.totalorder %s1396_s8, %s1390_s28 }
 0x1b8   : > { %p1393_p11 = pneg %p1392_p10  ;;  %p1399_p0 = por %p1398_p13, %p1397_p12 }
 0x1ba   : > { %p1400_p3 = pnand %p1399_p0, %p1393_p11 }
 0x1bc   : > { %1403 = shalt.err (!%p1400_p3)
}
 0x1bd   : > { %s1404_s16 = scalar_lea.hbm %s1745_s29, 16  ;;  %s1408_s17 = scalar_lea.hbm %s1822_s10, 32 }
 0x1be   : > { %p1405_p4 = scmp.ne.s32.totalorder %s1745_s29, %s1404_s16  ;;  %p1409_p7 = scmp.lt.s32.totalorder %s1745_s29, %s1822_s10 }
 0x1bf   : > { %p1410_p8 = scmp.lt.s32.totalorder %s1408_s17, %s1404_s16 }
 0x1c0   : > { %p1406_p5 = pnand %p1405_p4, %p1564_p1 }
 0x1c1   : > { %p1411_p9 = por %p1410_p8, %p1409_p7 }
 0x1c2   : > { %p1407_p6 = pneg %p1406_p5 }
 0x1c4   : > { %p1412_p10 = pnand %p1411_p9, %p1407_p6 }
 0x1c6   : > { %1415 = shalt.err (!%p1412_p10)
}
 0x1c7   : > { %1284 = dma.vmem_to_hbm [thread:$0]  (%p1564_p1), %s1747_s26, 16, %s1745_s29, %s1006_s19  }
 0x1c8 PF: > { %p1294_p11 = scmp.ge.s32.totalorder %s1456_s24, 2  ;;  %s1043_s13 = sand.u32 1, %s1444_s1  }
 0x1c9   : > { %s1044_s18 = scalar_lea.sflag [#allocation6], %s1043_s13 }
 0x1ca   : > { %p1288_p12 = pnand %p1294_p11, %p1568_p2 }
 0x1cc   : > { %p1289_p13 = pneg %p1288_p12 }
 0x1ce   : > { %1435 = dma.done.wait (%p1289_p13), %s1044_s18, 16  }
 0x1cf   : > { %1437 = vsyncadd (%p1289_p13), %s1044_s18, 4294967280  ;;  %s1052_s28 = scalar_lea.sflag [#allocation8], %s1043_s13 }
 0x1d0   : > { %1439 = dma.done.wait (%p1289_p13), %s1052_s28, 16  }
 0x1d1   : > { %1441 = vsyncadd (%p1289_p13), %s1052_s28, 4294967280  ;;  %p34_p1 = scmp.ge.s32.totalorder %s1551_s27, 4   ;;  %s1832_s1 = smov %s1448_s22 }
 0x1d2   : > { %s1833_s22 = smov %s1452_s23  ;;  %s1834_s23 = smov %s1562_s30 }
 0x1d3   : > { %s1835_s24 = smov %s1551_s27  ;;  %36 = sbr.rel (!%p34_p1) target bundleno = 31 (0x1f), region = 125 }
 0x1d8   :  { %1056 = vsyncpa [#allocation6], 1 }
 0x1d9   :  { %1058 = vsyncpa [#allocation6 + $0x1], 1 }
 0x1da   :  { %1059 = vsyncpa [#allocation8], 1 }
 0x1db   :  { %1061 = vsyncpa [#allocation8 + $0x1], 1 }

</bundles_post_ra>
